<compile_context>
chip_gen: v7x
topology: tpu7x:2x2x1
jax: 0.10.0
libtpu: 0.0.40
codegen_flags: <defaults>
</compile_context>

<pallas_src>
import jax
import jax.numpy as jnp
import numpy as np
from jax.experimental import pallas as pl
from jax.experimental.pallas import tpu as pltpu

PAD = 128  # lane-dense width for hidden/output dims


def irisnet_kernel(x_ref, w1_ref, wh_ref, b_ref, o_ref):
    # Fused 4-layer MLP on one batch tile: matmuls on the MXU (f32 accumulation),
    # bias-add + ReLU on the VPU, everything 128 lanes wide, all resident in VMEM.
    x = x_ref[...]                                       # (tb, 4)
    h = jnp.maximum(
        jnp.dot(x, w1_ref[...], preferred_element_type=jnp.float32)
        + b_ref[0:1, :], 0.0)                            # (tb, 128)
    h = jnp.maximum(
        jnp.dot(h, wh_ref[0], preferred_element_type=jnp.float32)
        + b_ref[1:2, :], 0.0)                            # (tb, 128) (64 live lanes)
    h = jnp.maximum(
        jnp.dot(h, wh_ref[1], preferred_element_type=jnp.float32)
        + b_ref[2:3, :], 0.0)                            # (tb, 128) (32 live lanes)
    out = (jnp.dot(h, wh_ref[2], preferred_element_type=jnp.float32)
           + b_ref[3:4, :])                              # (tb, 128) (3 live lanes)
    o_ref[...] = out.astype(o_ref.dtype)                 # unmasked, lane-dense store


def _round_up(x, m):
    return (x + m - 1) // m * m


def pack_params(params):
    """Zero-pad hidden/output dims to 128 and pack into three dense operands.

    Exactness: padded bias entries are 0 so padded output columns of each ReLU layer
    are ReLU(0) = 0; padded weight rows are 0 so those zero activations contribute
    nothing downstream. Output columns 3..127 are exactly 0 and get sliced off.
    """
    w1 = params["w1"]                                              # (4, 128)
    w2 = jnp.pad(params["w2"], ((0, 0), (0, PAD - 64)))            # (128, 128)
    w3 = jnp.pad(params["w3"], ((0, PAD - 64), (0, PAD - 32)))     # (128, 128)
    w4 = jnp.pad(params["w4"], ((0, PAD - 32), (0, PAD - 3)))      # (128, 128)
    wh = jnp.stack([w2, w3, w4], axis=0)                           # (3, 128, 128)

    b1 = params["b1"]                                              # (1, 128)
    b2 = jnp.pad(params["b2"], ((0, 0), (0, PAD - 64)))            # (1, 128)
    b3 = jnp.pad(params["b3"], ((0, 0), (0, PAD - 32)))            # (1, 128)
    b4 = jnp.pad(params["b4"], ((0, 0), (0, PAD - 3)))             # (1, 128)
    b = jnp.concatenate([b1, b2, b3, b4], axis=0)                  # (4, 128)

    return {"w1": w1, "wh": wh, "b": b}


def irisnet_forward(x, packed, *, block_b=1024):
    """x: (B, 4) float32. packed: output of pack_params. Returns (B, 3) float32."""
    w1, wh, b = packed["w1"], packed["wh"], packed["b"]

    B, F = x.shape
    # Batch tile: multiple of 8 (sublane granule), capped so VMEM stays tiny even on
    # v7x's scoped default (tb=1024 => ~1 MiB of double-buffered x/out blocks plus
    # ~0.4 MiB of resident weights).
    tb = min(block_b, _round_up(B, 8))
    B_pad = _round_up(B, tb)
    if B_pad != B:
        x = jnp.pad(x, ((0, B_pad - B), (0, 0)))

    grid = (B_pad // tb,)
    resident = lambda a: pl.BlockSpec(a.shape, lambda i: (0,) * a.ndim)

    out_pad = pl.pallas_call(
        irisnet_kernel,
        out_shape=jax.ShapeDtypeStruct((B_pad, PAD), jnp.float32),
        grid_spec=pltpu.PrefetchScalarGridSpec(
            num_scalar_prefetch=0,
            grid=grid,
            in_specs=[
                pl.BlockSpec((tb, F), lambda i: (i, 0)),   # x: tiled over batch
                resident(w1),                              # (4, 128)   weights, resident
                resident(wh),                              # (3,128,128) weights, resident
                resident(b),                               # (4, 128)   biases, resident
            ],
            out_specs=pl.BlockSpec((tb, PAD), lambda i: (i, 0)),  # lane-dense slab
        ),
        compiler_params=pltpu.CompilerParams(
            dimension_semantics=("parallel",)),  # shard batch grid across TCs on v7x
    )(x, w1, wh, b)

    return out_pad[:B, :3]


def init_params(key):
    """Deterministic init matching PyTorch layer shapes (stored transposed, (in, out))."""
    dims = [(4, 128), (128, 64), (64, 32), (32, 3)]
    params = {}
    for i, (fan_in, fan_out) in enumerate(dims, start=1):
        key, kw, kb = jax.random.split(key, 3)
        bound = 1.0 / np.sqrt(fan_in)  # PyTorch nn.Linear default uniform bound
        params[f"w{i}"] = jax.random.uniform(
            kw, (fan_in, fan_out), jnp.float32, -bound, bound)
        params[f"b{i}"] = jax.random.uniform(
            kb, (1, fan_out), jnp.float32, -bound, bound)
    return params


def irisnet_reference(x, p):
    h = jnp.maximum(x @ p["w1"] + p["b1"], 0.0)
    h = jnp.maximum(h @ p["w2"] + p["b2"], 0.0)
    h = jnp.maximum(h @ p["w3"] + p["b3"], 0.0)
    return h @ p["w4"] + p["b4"]


if __name__ == "__main__":
    key = jax.random.PRNGKey(0)
    key, kx = jax.random.split(key)
    batch = 8
    x = jax.random.normal(kx, (batch, 4), jnp.float32)  # Iris has 4 features
    params = init_params(key)
    packed = pack_params(params)

    out = irisnet_forward(x, packed)
    out = jax.block_until_ready(out)

    ref = irisnet_reference(x, params)
    np.testing.assert_allclose(np.asarray(out), np.asarray(ref), rtol=1e-5, atol=1e-5)

    print("KERNEL_OK")
</pallas_src>

<mosaic_0001>
module attributes {stable_mosaic.version = 11 : i64} {
  func.func @irisnet_kernel(%arg0: i32, %arg1: memref<8x4xf32, #tpu.memory_space<vmem>>, %arg2: memref<4x128xf32, #tpu.memory_space<vmem>>, %arg3: memref<3x128x128xf32, #tpu.memory_space<vmem>>, %arg4: memref<4x128xf32, #tpu.memory_space<vmem>>, %arg5: memref<8x128xf32, #tpu.memory_space<vmem>>) attributes {dimension_semantics = [#tpu.dimension_semantics<parallel>], iteration_bounds = array<i64: 1>, scalar_prefetch = 0 : i64, scratch_operands = 0 : i64, tpu.core_type = #tpu.core_type<tc>, window_params = [{transform_indices = @transform_0, window_bounds = array<i64: 8, 4>}, {pipeline_mode = #tpu.pipeline_mode<synchronous>, transform_indices = @transform_1, window_bounds = array<i64: 4, 128>}, {pipeline_mode = #tpu.pipeline_mode<synchronous>, transform_indices = @transform_2, window_bounds = array<i64: 3, 128, 128>}, {pipeline_mode = #tpu.pipeline_mode<synchronous>, transform_indices = @transform_3, window_bounds = array<i64: 4, 128>}, {transform_indices = @transform_4, window_bounds = array<i64: 8, 128>}]} {
    %c0 = arith.constant 0 : index
    %c0_0 = arith.constant 0 : index
    %0 = vector.load %arg1[%c0, %c0_0] : memref<8x4xf32, #tpu.memory_space<vmem>>, vector<8x4xf32>
    %c0_1 = arith.constant 0 : index
    %c0_2 = arith.constant 0 : index
    %1 = vector.load %arg2[%c0_1, %c0_2] : memref<4x128xf32, #tpu.memory_space<vmem>>, vector<4x128xf32>
    %cst = arith.constant dense<0.000000e+00> : vector<8x128xf32>
    %2 = tpu.matmul %0, %1, %cst {dimension_numbers = #tpu.dot_dimension_numbers<[1], [0], [0], [1], [0, 0, 1, 1], [], []>} : vector<8x4xf32>, vector<4x128xf32>, vector<8x128xf32> -> vector<8x128xf32>
    %c0_3 = arith.constant 0 : index
    %c0_4 = arith.constant 0 : index
    %3 = vector.load %arg4[%c0_3, %c0_4] : memref<4x128xf32, #tpu.memory_space<vmem>>, vector<1x128xf32>
    %4 = vector.broadcast %3 : vector<1x128xf32> to vector<8x128xf32>
    %5 = arith.addf %2, %4 : vector<8x128xf32>
    %cst_5 = arith.constant 0.000000e+00 : f32
    %6 = vector.broadcast %cst_5 : f32 to vector<8x128xf32>
    %7 = arith.maximumf %5, %6 : vector<8x128xf32>
    %c0_6 = arith.constant 0 : index
    %c0_7 = arith.constant 0 : index
    %c0_8 = arith.constant 0 : index
    %8 = vector.load %arg3[%c0_6, %c0_7, %c0_8] : memref<3x128x128xf32, #tpu.memory_space<vmem>>, vector<1x128x128xf32>
    %9 = vector.shape_cast %8 : vector<1x128x128xf32> to vector<128x128xf32>
    %cst_9 = arith.constant dense<0.000000e+00> : vector<8x128xf32>
    %10 = tpu.matmul %7, %9, %cst_9 {dimension_numbers = #tpu.dot_dimension_numbers<[1], [0], [0], [1], [0, 0, 1, 1], [], []>} : vector<8x128xf32>, vector<128x128xf32>, vector<8x128xf32> -> vector<8x128xf32>
    %c1 = arith.constant 1 : index
    %c0_10 = arith.constant 0 : index
    %11 = vector.load %arg4[%c1, %c0_10] : memref<4x128xf32, #tpu.memory_space<vmem>>, vector<1x128xf32>
    %12 = vector.broadcast %11 : vector<1x128xf32> to vector<8x128xf32>
    %13 = arith.addf %10, %12 : vector<8x128xf32>
    %cst_11 = arith.constant 0.000000e+00 : f32
    %14 = vector.broadcast %cst_11 : f32 to vector<8x128xf32>
    %15 = arith.maximumf %13, %14 : vector<8x128xf32>
    %c1_12 = arith.constant 1 : index
    %c0_13 = arith.constant 0 : index
    %c0_14 = arith.constant 0 : index
    %16 = vector.load %arg3[%c1_12, %c0_13, %c0_14] : memref<3x128x128xf32, #tpu.memory_space<vmem>>, vector<1x128x128xf32>
    %17 = vector.shape_cast %16 : vector<1x128x128xf32> to vector<128x128xf32>
    %cst_15 = arith.constant dense<0.000000e+00> : vector<8x128xf32>
    %18 = tpu.matmul %15, %17, %cst_15 {dimension_numbers = #tpu.dot_dimension_numbers<[1], [0], [0], [1], [0, 0, 1, 1], [], []>} : vector<8x128xf32>, vector<128x128xf32>, vector<8x128xf32> -> vector<8x128xf32>
    %c2 = arith.constant 2 : index
    %c0_16 = arith.constant 0 : index
    %19 = vector.load %arg4[%c2, %c0_16] : memref<4x128xf32, #tpu.memory_space<vmem>>, vector<1x128xf32>
    %20 = vector.broadcast %19 : vector<1x128xf32> to vector<8x128xf32>
    %21 = arith.addf %18, %20 : vector<8x128xf32>
    %cst_17 = arith.constant 0.000000e+00 : f32
    %22 = vector.broadcast %cst_17 : f32 to vector<8x128xf32>
    %23 = arith.maximumf %21, %22 : vector<8x128xf32>
    %c2_18 = arith.constant 2 : index
    %c0_19 = arith.constant 0 : index
    %c0_20 = arith.constant 0 : index
    %24 = vector.load %arg3[%c2_18, %c0_19, %c0_20] : memref<3x128x128xf32, #tpu.memory_space<vmem>>, vector<1x128x128xf32>
    %25 = vector.shape_cast %24 : vector<1x128x128xf32> to vector<128x128xf32>
    %cst_21 = arith.constant dense<0.000000e+00> : vector<8x128xf32>
    %26 = tpu.matmul %23, %25, %cst_21 {dimension_numbers = #tpu.dot_dimension_numbers<[1], [0], [0], [1], [0, 0, 1, 1], [], []>} : vector<8x128xf32>, vector<128x128xf32>, vector<8x128xf32> -> vector<8x128xf32>
    %c3 = arith.constant 3 : index
    %c0_22 = arith.constant 0 : index
    %27 = vector.load %arg4[%c3, %c0_22] : memref<4x128xf32, #tpu.memory_space<vmem>>, vector<1x128xf32>
    %28 = vector.broadcast %27 : vector<1x128xf32> to vector<8x128xf32>
    %29 = arith.addf %26, %28 : vector<8x128xf32>
    %c0_23 = arith.constant 0 : index
    %c0_24 = arith.constant 0 : index
    %30 = vector.load %arg5[%c0_23, %c0_24] : memref<8x128xf32, #tpu.memory_space<vmem>>, vector<8x128xf32>
    tpu.vector_store %arg5[%c0_23, %c0_24], %29 {strides = array<i32>} : memref<8x128xf32, #tpu.memory_space<vmem>>, vector<8x128xf32>,
    return
  }
  func.func @transform_0(%arg0: i32) -> (i32, i32) {
    %c0_i32 = arith.constant 0 : i32
    %c0_i32_0 = arith.constant 0 : i32
    return %arg0, %c0_i32 : i32, i32
  }
  func.func @transform_1(%arg0: i32) -> (i32, i32) {
    %c0_i32 = arith.constant 0 : i32
    %c0_i32_0 = arith.constant 0 : i32
    %c0_i32_1 = arith.constant 0 : i32
    return %c0_i32, %c0_i32_0 : i32, i32
  }
  func.func @transform_2(%arg0: i32) -> (i32, i32, i32) {
    %c0_i32 = arith.constant 0 : i32
    %c0_i32_0 = arith.constant 0 : i32
    %c0_i32_1 = arith.constant 0 : i32
    %c0_i32_2 = arith.constant 0 : i32
    return %c0_i32, %c0_i32_0, %c0_i32_1 : i32, i32, i32
  }
  func.func @transform_3(%arg0: i32) -> (i32, i32) {
    %c0_i32 = arith.constant 0 : i32
    %c0_i32_0 = arith.constant 0 : i32
    %c0_i32_1 = arith.constant 0 : i32
    return %c0_i32, %c0_i32_0 : i32, i32
  }
  func.func @transform_4(%arg0: i32) -> (i32, i32) {
    %c0_i32 = arith.constant 0 : i32
    %c0_i32_0 = arith.constant 0 : i32
    return %arg0, %c0_i32 : i32, i32
  }
}

</mosaic_0001>

<bundles_post_ra>
// kernel: tpu_custom_call.1
= control target key start
LH: loop header
LB: loop body
LE: loop exit
PB: predicated region body
PF: predicated region fallthrough
CT: control target
= control target key end

     0   :  { %9 = vsyncpa [#allocation3], 0  ;;  %s814_s0 = inlined_call_operand.vmem [shape: f32[8,4], index: 0, kind: input, shape index: {}]   ;;  %s815_s1 = inlined_call_operand.vmem [shape: f32[4,128], index: 1, kind: input, shape index: {}]   ;;  %s816_s2 = inlined_call_operand.hbm [shape: f32[3,128,128], index: 2, kind: input, shape index: {}]   ;;  %s817_s3 = inlined_call_operand.vmem [shape: f32[4,128], index: 3, kind: input, shape index: {}]   ;;  %s818_s4 = inlined_call_operand.hbm [shape: f32[8,128], index: 4, kind: output, shape index: {}]  }
   0x1   :  { %10 = vsyncpa [#allocation4], 0  ;;  %s707_s15 = smov [#allocation2]   ;;  %s659_s19 = scalar_lea.hbm %s816_s2, 6144 }
   0x2   :  { %s20_s16 = sshll.u32 %s707_s15, 4  ;;  %p660_p0 = scmp.ne.s32.totalorder %s816_s2, %s659_s19  ;;  %s21_s16 = int_to_ptr.vmem [resolvable:$true] %s20_s16 }
   0x3   :  { %p663_p1 = scmp.lt.u32.totalorder %s659_s19, %s816_s2 }
   0x5   :  { %p665_p2 = pnand %p663_p1, %p660_p0 }
   0x7   :  { %668 = shalt.err (!%p665_p2)
}
   0x8   :  { %s669_s24 = scalar_lea.vmem %s21_s16, 6144  ;;  %p674_p4 = scmp.lt.s32.totalorder %s21_s16, %s21_s16 }
   0x9   :  { %p670_p3 = scmp.ne.s32.totalorder %s21_s16, %s669_s24  ;;  %p675_p5 = scmp.lt.s32.totalorder %s669_s24, %s669_s24 }
   0xb   :  { %p676_p6 = por %p675_p5, %p674_p4 }
   0xd   :  { %p677_p7 = pnand %p676_p6, %p670_p3 }
   0xf   :  { %680 = shalt.err (!%p677_p7)
}
  0x10   :  { %s708_s25 = smov 128   ;;  %s709_s26 = smov 8  }
  0x11   :  { %26 = dma.hbm_to_vmem [thread:$0]  %s816_s2, 6144, %s21_s16, [#allocation3], %s708_s25, %s708_s25, %s709_s26  }
  0x12   :  { %703 = dma.done.wait [#allocation3], 6144  }
  0x13   :  { %704 = vsyncadd [#allocation3], 4294961152  ;;  %v710_v0 = vmov 0.0   ;;  %vm711_vm0 = vmmov 0   ;;  %v712_v1 = vmov 0.0|0.0   ;;  %vm43_vm1 = vcmask 1043456  }
  0x14   :  { %470 = vmatprep.subr.mxu0 %v710_v0  ;;  %472 = vmatprep.mubr.msk.f32.mxu0 %vm711_vm0, %v710_v0  ;;  %vm39_vm2 = vcmask 31744   ;;  %v33_v2 = vld [vmem:[%s815_s1] sm:$0xf]  ;;  %v118_v4 = vld [vmem:[#allocation2] sm:$0xff]  ;;  %v120_v6 = vld [vmem:[#allocation2 + $0x10] sm:$0xff]  ;;  %s713_s12 = smov [#allocation5]  }
  0x15   :  { %580 = vmatprep.subr.bf16.mxu1 %v712_v1  ;;  %507 = vmatprep.mubr.msk.f32.mxu1 %vm711_vm0, %v710_v0  ;;  %v32_v3 = vld [vmem:[%s814_s0] sm:$0xff]  ;;  %v121_v7 = vld [vmem:[#allocation2 + $0x18] sm:$0xff]  ;;  %v122_v10 = vld [vmem:[#allocation2 + $0x20] sm:$0xff]  ;;  %s402_s13 = sshll.u32 %s713_s12, 4  ;;  %s403_s13 = int_to_ptr.vmem [resolvable:$true] %s402_s13 }
  0x16   :  { %471 = vmatpush3.msk.msra.mxu0 %vm43_vm1, %v33_v2  ;;  %v119_v5 = vld [vmem:[#allocation2 + $0x8] sm:$0xff]  ;;  %v584_v9 = vpack.c.bf16 %v121_v7, %v120_v6  ;;  %v124_v13 = vld [vmem:[#allocation2 + $0x30] sm:$0xff]  ;;  %v125_v14 = vld [vmem:[#allocation2 + $0x38] sm:$0xff]  ;;  %s681_s14 = scalar_lea.vmem %s403_s13, 128  ;;  %p686_p9 = scmp.lt.s32.totalorder %s403_s13, %s403_s13 }
  0x17   :  { %473 = vmatmul.mubr.msk.f32.vlgmr.msra.gmra.mrb[0].mxu0 %vm39_vm2, %v32_v3  ;;  %v581_v8 = vpack.c.bf16 %v119_v5, %v118_v4  ;;  %604 = vmatprep.subr.bf16.mxu0 %v712_v1  ;;  %v123_v11 = vld [vmem:[#allocation2 + $0x28] sm:$0xff]  ;;  %v590_v15 = vpack.c.bf16 %v125_v14, %v124_v13  ;;  %v126_v16 = vld [vmem:[#allocation2 + $0x40] sm:$0xff]  ;;  %v128_v19 = vld [vmem:[#allocation2 + $0x50] sm:$0xff]  ;;  %p682_p8 = scmp.ne.s32.totalorder %s403_s13, %s681_s14  ;;  %p687_p10 = scmp.lt.s32.totalorder %s681_s14, %s681_s14 }
  0x18   :  { %542 = vmatprep.mubr.msk.f32.mxu0 %vm711_vm0, %v710_v0  ;;  %v587_v12 = vpack.c.bf16 %v123_v11, %v122_v10  ;;  %v127_v17 = vld [vmem:[#allocation2 + $0x48] sm:$0xff]  ;;  %v129_v20 = vld [vmem:[#allocation2 + $0x58] sm:$0xff]  ;;  %v130_v22 = vld [vmem:[#allocation2 + $0x60] sm:$0xff] }
  0x19   :  { %582 = vmatpush3.bf16.msra.mxu1 %v581_v8  ;;  %v593_v18 = vpack.c.bf16 %v127_v17, %v126_v16  ;;  %v596_v21 = vpack.c.bf16 %v129_v20, %v128_v19  ;;  %v131_v23 = vld [vmem:[#allocation2 + $0x68] sm:$0xff]  ;;  %v132_v25 = vld [vmem:[#allocation2 + $0x70] sm:$0xff]  ;;  %v133_v26 = vld [vmem:[#allocation2 + $0x78] sm:$0xff]  ;;  %p688_p11 = por %p687_p10, %p686_p9 }
  0x1a   :  { %583 = vmatprep.subr.bf16.mxu1 %v712_v1  ;;  %v599_v24 = vpack.c.bf16 %v131_v23, %v130_v22  ;;  %v602_v27 = vpack.c.bf16 %v133_v26, %v132_v25  ;;  %v211_v28 = vld [vmem:[#allocation2 + $0x80] sm:$0xff]  ;;  %v212_v29 = vld [vmem:[#allocation2 + $0x88] sm:$0xff]  ;;  %v213_v30 = vld [vmem:[#allocation2 + $0x90] sm:$0xff] }
  0x1b   :  { %v605_v31 = vpack.c.bf16 %v212_v29, %v211_v28  ;;  %v214_v32 = vld [vmem:[#allocation2 + $0x98] sm:$0xff]  ;;  %v215_v34 = vld [vmem:[#allocation2 + $0xa0] sm:$0xff]  ;;  %v216_v35 = vld [vmem:[#allocation2 + $0xa8] sm:$0xff]  ;;  %p689_p12 = pnand %p688_p11, %p682_p8 }
  0x1c   :  { %v608_v33 = vpack.c.bf16 %v214_v32, %v213_v30  ;;  %v611_v36 = vpack.c.bf16 %v216_v35, %v215_v34  ;;  %v217_v37 = vld [vmem:[#allocation2 + $0xb0] sm:$0xff]  ;;  %v218_v38 = vld [vmem:[#allocation2 + $0xb8] sm:$0xff]  ;;  %v219_v40 = vld [vmem:[#allocation2 + $0xc0] sm:$0xff] }
  0x1d   :  { %585 = vmatpush3.bf16.msra.mxu1 %v584_v9  ;;  %606 = vmatpush3.bf16.msra.mxu0 %v605_v31  ;;  %v614_v39 = vpack.c.bf16 %v218_v38, %v217_v37  ;;  %v220_v41 = vld [vmem:[#allocation2 + $0xc8] sm:$0xff]  ;;  %v221_v43 = vld [vmem:[#allocation2 + $0xd0] sm:$0xff]  ;;  %v222_v44 = vld [vmem:[#allocation2 + $0xd8] sm:$0xff] }
  0x1e   :  { %586 = vmatprep.subr.bf16.mxu1 %v712_v1  ;;  %607 = vmatprep.subr.bf16.mxu0 %v712_v1  ;;  %v617_v42 = vpack.c.bf16 %v220_v41, %v219_v40  ;;  %v620_v45 = vpack.c.bf16 %v222_v44, %v221_v43  ;;  %v223_v46 = vld [vmem:[#allocation2 + $0xe0] sm:$0xff]  ;;  %v224_v47 = vld [vmem:[#allocation2 + $0xe8] sm:$0xff]  ;;  %v225_v54 = vld [vmem:[#allocation2 + $0xf0] sm:$0xff] }
  0x1f   :  { %v623_v48 = vpack.c.bf16 %v224_v47, %v223_v46  ;;  %v411_v49 = vld [vmem:[%s817_s3] ss:$0 sm:$0xff]  ;;  %v226_v55 = vld [vmem:[#allocation2 + $0xf8] sm:$0xff]  ;;  %v304_v57 = vld [vmem:[#allocation2 + $0x100] sm:$0xff] }
  0x20   :  { %v626_v56 = vpack.c.bf16 %v226_v55, %v225_v54  ;;  %v305_v58 = vld [vmem:[#allocation2 + $0x108] sm:$0xff]  ;;  %v306_v59 = vld [vmem:[#allocation2 + $0x110] sm:$0xff]  ;;  %v307_v61 = vld [vmem:[#allocation2 + $0x118] sm:$0xff] }
  0x21   :  { %588 = vmatpush3.bf16.msra.mxu1 %v587_v12  ;;  %609 = vmatpush3.bf16.msra.mxu0 %v608_v33  ;;  %v629_v60 = vpack.c.bf16 %v305_v58, %v304_v57  ;;  %v632_v62 = vpack.c.bf16 %v307_v61, %v306_v59  ;;  %v308_v63 = vld [vmem:[#allocation2 + $0x120] sm:$0xff]  ;;  %v309_v2 = vld [vmem:[#allocation2 + $0x128] sm:$0xff]  ;;  %v311_v4 = vld [vmem:[#allocation2 + $0x138] sm:$0xff] }
  0x22   :  { %589 = vmatprep.subr.bf16.mxu1 %v712_v1  ;;  %610 = vmatprep.subr.bf16.mxu0 %v712_v1  ;;  %v635_v3 = vpack.c.bf16 %v309_v2, %v308_v63  ;;  %v312_v6 = vld [vmem:[#allocation2 + $0x140] sm:$0xff]  ;;  %v313_v7 = vld [vmem:[#allocation2 + $0x148] sm:$0xff]  ;;  %v314_v9 = vld [vmem:[#allocation2 + $0x150] sm:$0xff] }
  0x23   :  { %v641_v8 = vpack.c.bf16 %v313_v7, %v312_v6  ;;  %v315_v10 = vld [vmem:[#allocation2 + $0x158] sm:$0xff]  ;;  %v316_v12 = vld [vmem:[#allocation2 + $0x160] sm:$0xff]  ;;  %v317_v13 = vld [vmem:[#allocation2 + $0x168] sm:$0xff] }
  0x24   :  { %v644_v11 = vpack.c.bf16 %v315_v10, %v314_v9  ;;  %v647_v14 = vpack.c.bf16 %v317_v13, %v316_v12  ;;  %v318_v20 = vld [vmem:[#allocation2 + $0x170] sm:$0xff]  ;;  %v415_v23 = vld [vmem:[%s817_s3 + $0x2] ss:$0 sm:$0xff] }
  0x25   :  { %591 = vmatpush3.bf16.msra.mxu1 %v590_v15  ;;  %612 = vmatpush3.bf16.msra.mxu0 %v611_v36  ;;  %v414_v15 = vld [vmem:[%s817_s3 + $0x1] ss:$0 sm:$0xff] }
  0x26   :  { %592 = vmatprep.subr.bf16.mxu1 %v712_v1  ;;  %613 = vmatprep.subr.bf16.mxu0 %v712_v1 }
  0x29   :  { %594 = vmatpush3.bf16.msra.mxu1 %v593_v18  ;;  %615 = vmatpush3.bf16.msra.mxu0 %v614_v39 }
  0x2a   :  { %595 = vmatprep.subr.bf16.mxu1 %v712_v1  ;;  %616 = vmatprep.subr.bf16.mxu0 %v712_v1 }
  0x2d   :  { %597 = vmatpush3.bf16.msra.mxu1 %v596_v21  ;;  %618 = vmatpush3.bf16.msra.mxu0 %v617_v42  ;;  %v319_v21 = vld [vmem:[#allocation2 + $0x178] sm:$0xff] }
  0x2e   :  { %598 = vmatprep.subr.bf16.mxu1 %v712_v1  ;;  %619 = vmatprep.subr.bf16.mxu0 %v712_v1  ;;  %v650_v22 = vpack.c.bf16 %v319_v21, %v318_v20 }
  0x31   :  { %600 = vmatpush3.bf16.msra.mxu1 %v599_v24  ;;  %621 = vmatpush3.bf16.msra.mxu0 %v620_v45 }
  0x32   :  { %601 = vmatprep.subr.bf16.mxu1 %v712_v1  ;;  %622 = vmatprep.subr.bf16.mxu0 %v712_v1 }
  0x35   :  { %603 = vmatpush3.bf16.msra.mxu1 %v602_v27  ;;  %624 = vmatpush3.bf16.msra.mxu0 %v623_v48  ;;  %v416_v27 = vld [vmem:[%s817_s3 + $0x3] ss:$0 sm:$0xff] }
  0x36   :  { %628 = vmatprep.subr.bf16.mxu1 %v712_v1  ;;  %625 = vmatprep.subr.bf16.mxu0 %v712_v1 }
  0x39   :  { %627 = vmatpush3.bf16.msra.mxu0 %v626_v56 }
  0xea   :  { %v113_v50 = vpop.f32.mrb[0].mxu0 }
  0xeb   :  { %v114_v51 = vadd.f32 %v411_v49, %v113_v50  ;;  %v474_v52 = vpop.f32.mrb[1].mxu0 }
  0xed   :  { %v117_v53 = vmax.f32 %v114_v51, 0.0 }
  0xef   :  { %508 = vmatmul.mubr.f32.vlgmr.msra.gmra.mrb[0].mxu1 %v117_v53 }
  0xf0   :  { %577 = vmatprep.mubr.msk.f32.mxu1 %vm711_vm0, %v710_v0  ;;  %630 = vmatpush3.bf16.msra.mxu1 %v629_v60  ;;  %v310_v0 = vld [vmem:[#allocation2 + $0x130] sm:$0xff] }
  0xf1   :  { %631 = vmatprep.subr.bf16.mxu1 %v712_v1  ;;  %v638_v5 = vpack.c.bf16 %v311_v4, %v310_v0 }
  0xf4   :  { %633 = vmatpush3.bf16.msra.mxu1 %v632_v62 }
  0xf5   :  { %634 = vmatprep.subr.bf16.mxu1 %v712_v1 }
  0xf8   :  { %636 = vmatpush3.bf16.msra.mxu1 %v635_v3 }
  0xf9   :  { %637 = vmatprep.subr.bf16.mxu1 %v712_v1 }
  0xfc   :  { %639 = vmatpush3.bf16.msra.mxu1 %v638_v5 }
  0xfd   :  { %640 = vmatprep.subr.bf16.mxu1 %v712_v1 }
 0x100   :  { %642 = vmatpush3.bf16.msra.mxu1 %v641_v8 }
 0x101   :  { %643 = vmatprep.subr.bf16.mxu1 %v712_v1 }
 0x104   :  { %645 = vmatpush3.bf16.msra.mxu1 %v644_v11 }
 0x105   :  { %646 = vmatprep.subr.bf16.mxu1 %v712_v1 }
 0x108   :  { %648 = vmatpush3.bf16.msra.mxu1 %v647_v14 }
 0x109   :  { %649 = vmatprep.subr.bf16.mxu1 %v712_v1 }
 0x10c   :  { %651 = vmatpush3.bf16.msra.mxu1 %v650_v22 }
 0x1c2   :  { %v205_v16 = vpop.f32.mrb[0].mxu1 }
 0x1c3   :  { %v206_v17 = vadd.f32 %v414_v15, %v205_v16  ;;  %v509_v18 = vpop.f32.mrb[1].mxu1 }
 0x1c5   :  { %v209_v19 = vmax.f32 %v206_v17, 0.0 }
 0x1c7   :  { %543 = vmatmul.mubr.f32.vlgmr.msra.gmra.mrb[2].mxu0 %v209_v19 }
 0x29a   :  { %v298_v24 = vpop.f32.mrb[2].mxu0 }
 0x29b   :  { %v299_v25 = vadd.f32 %v415_v23, %v298_v24  ;;  %v544_v1 = vpop.f32.mrb[3].mxu0 }
 0x29d   :  { %v302_v26 = vmax.f32 %v299_v25, 0.0 }
 0x29f   :  { %578 = vmatmul.mubr.f32.vlgmr.msra.gmra.mrb[2].mxu1 %v302_v26 }
 0x372   :  { %v391_v28 = vpop.f32.mrb[2].mxu1 }
 0x373   :  { %v392_v29 = vadd.f32 %v416_v27, %v391_v28  ;;  %v579_v30 = vpop.f32.mrb[3].mxu1 }
 0x375   :  { %395 = vst [vmem:[#allocation5] sm:$0xff] %v392_v29 }
 0x376   :  { %692 = shalt.err (!%p689_p12)
}
 0x377   :  { %s693_s17 = scalar_lea.hbm %s818_s4, 128 }
 0x378   :  { %p694_p13 = scmp.ne.s32.totalorder %s818_s4, %s693_s17  ;;  %p697_p0 = scmp.lt.u32.totalorder %s693_s17, %s818_s4 }
 0x37a   :  { %p699_p1 = pnand %p697_p0, %p694_p13 }
 0x37c   :  { %702 = shalt.err (!%p699_p1)
}
 0x37d   :  { %405 = dma.vmem_to_hbm [thread:$0]  %s403_s13, 128, %s818_s4, [#allocation4]  }
 0x37e   :  { %705 = dma.done.wait [#allocation4], 128  }
 0x37f   :  { %706 = vsyncadd [#allocation4], 4294967168 }
 0x380   :  { %409 = vsyncpa [#allocation3], 1 }
 0x381   :  { %410 = vsyncpa [#allocation4], 1 }

</bundles_post_ra>
